<compile_context>
chip_gen: v7x
topology: tpu7x:2x2x1
jax: 0.10.0
libtpu: 0.0.40
codegen_flags: <defaults>
</compile_context>

<pallas_src>
import math
import functools

import jax
import jax.numpy as jnp
from jax import lax
from jax.experimental import pallas as pl
from jax.experimental.pallas import tpu as pltpu

_NEG_BIG = -1e30   # finite "-inf" for the causal mask (NaN-safe)
_LANE = 128        # TPU lane width; per-head slice stride is padded to this


def _round_up(x, m):
    return (x + m - 1) // m * m


def _pick_tile(T):
    """Largest query/key tile <= 256 that divides T (sublane aligned)."""
    for cand in (256, 128, 64, 32, 16, 8):
        if T % cand == 0:
            return cand
    return T


def _default_exp_dtype():
    # v6e / v7x have a bf16-capable EUP (~2x transcendental throughput);
    # v5e and older do not -> keep the softmax exp in f32 there.
    try:
        kind = jax.devices()[0].device_kind.lower()
    except Exception:
        return jnp.float32
    if ("v6" in kind) or ("v7" in kind):
        return jnp.bfloat16
    return jnp.float32


def _qkv_attention_kernel(x_ref, wq_ref, wkv_ref, wo_ref, o_ref,
                          k_scr, v_scr, m_scr, l_scr, acc_scr,
                          *, H: int, Dqk_p: int, Dv_p: int,
                          tq: int, n_kv: int, causal: bool, exp_dtype):
    # x_ref   : (1, T, C)              bf16  -- full sequence of current batch elem
    # wq_ref  : (C, H*Dqk_p)           bf16  -- Q weights, 1/sqrt(Dqk) folded in
    # wkv_ref : (C, H*(Dqk_p+Dv_p))    bf16  -- fused [K | V] weights
    # wo_ref  : (H*Dv_p, C)            bf16  -- output projection (zero-padded rows)
    # o_ref   : (1, tq, C)             f32   -- this query block's output
    # k_scr   : (T, H*Dqk_p)  bf16 scratch   -- cached K projection (per batch elem)
    # v_scr   : (T, H*Dv_p)   bf16 scratch   -- cached V projection
    # m_scr/l_scr : (tq, 1)   f32  scratch   -- online-softmax running max / sum
    # acc_scr : (tq, Dv_p)    f32  scratch   -- online-softmax context accumulator
    qi = pl.program_id(1)
    C = o_ref.shape[2]

    # K/V projection of the whole sequence: computed ONCE per batch element
    # (q-block axis is innermost & "arbitrary", so qi == 0 runs first).
    @pl.when(qi == 0)
    def _():
        kv = jnp.dot(x_ref[0], wkv_ref[...], preferred_element_type=jnp.float32)
        k_scr[...] = kv[:, :H * Dqk_p].astype(jnp.bfloat16)
        v_scr[...] = kv[:, H * Dqk_p:].astype(jnp.bfloat16)

    # Q projection for this query block only (scale already folded into wq).
    q_start = pl.multiple_of(qi * tq, tq)
    x_q = x_ref[0, pl.ds(q_start, tq), :]                          # (tq, C) bf16
    q_all = jnp.dot(x_q, wq_ref[...],
                    preferred_element_type=jnp.float32)            # (tq, H*Dqk_p)

    if causal:
        # Within-block causal mask, needed only on the DIAGONAL kv tile.
        # Both blocks start at qi*tq, so the mask is grid-invariant.
        r = lax.broadcasted_iota(jnp.int32, (tq, tq), 0)
        c = lax.broadcasted_iota(jnp.int32, (tq, tq), 1)
        diag_mask = jnp.where(r < c, _NEG_BIG, 0.0).astype(jnp.float32)

    out_acc = jnp.zeros((tq, C), jnp.float32)

    for h in range(H):                       # H is small and static
        q_h = q_all[:, h * Dqk_p:(h + 1) * Dqk_p].astype(jnp.bfloat16)

        # init online-softmax state for this head
        m_scr[...] = jnp.full((tq, 1), -jnp.inf, jnp.float32)
        l_scr[...] = jnp.zeros((tq, 1), jnp.float32)
        acc_scr[...] = jnp.zeros((tq, Dv_p), jnp.float32)

        def kv_step(j, masked):
            ks = pl.multiple_of(j * tq, tq)
            k_t = k_scr[pl.ds(ks, tq), h * Dqk_p:(h + 1) * Dqk_p]   # (tq, Dqk_p) bf16
            v_t = v_scr[pl.ds(ks, tq), h * Dv_p:(h + 1) * Dv_p]     # (tq, Dv_p)  bf16
            # scores: contract last dims (no in-kernel transpose)
            s = lax.dot_general(q_h, k_t, (((1,), (1,)), ((), ())),
                                preferred_element_type=jnp.float32)  # (tq, tq)
            if masked:
                s = s + diag_mask
            m_i = m_scr[...]
            m_new = jnp.maximum(m_i, jnp.max(s, axis=-1, keepdims=True))
            alpha = jnp.exp(m_i - m_new)                             # (tq, 1) f32
            # exp in bf16 on v6e/v7x (EUP), f32 elsewhere; sums stay f32
            p = jnp.exp((s - m_new).astype(exp_dtype))
            l_scr[...] = alpha * l_scr[...] + jnp.sum(
                p.astype(jnp.float32), axis=-1, keepdims=True)
            acc_scr[...] = alpha * acc_scr[...] + jnp.dot(
                p.astype(jnp.bfloat16), v_t, preferred_element_type=jnp.float32)
            m_scr[...] = m_new

        if causal:
            # tiles strictly below the diagonal: unmasked
            @pl.loop(0, qi)
            def _(j):
                kv_step(j, False)
            # diagonal tile: within-block mask; tiles above diag are skipped
            kv_step(qi, True)
        else:
            @pl.loop(0, n_kv)
            def _(j):
                kv_step(j, False)

        # Deferred normalization on (tq, Dv_p) instead of (tq, T).
        y_h = acc_scr[...] * pl.reciprocal(l_scr[...], approx=True)
        # Fold this head's slice of w_o -> (tq, C) accumulator (no concat).
        out_acc = out_acc + jnp.dot(y_h.astype(jnp.bfloat16),
                                    wo_ref[h * Dv_p:(h + 1) * Dv_p, :],
                                    preferred_element_type=jnp.float32)

    o_ref[0] = out_acc.astype(o_ref.dtype)


def qkv_attention(x, w_q, w_k, w_v, w_o, *, causal=False, exp_dtype=None):
    """x: (N, T, C); w_q/w_k: (H, Dqk, C); w_v: (H, Dv, C); w_o: (H*Dv, C)."""
    N, T, C = x.shape
    H, Dqk, _ = w_q.shape
    _, Dv, _ = w_v.shape
    assert w_o.shape == (H * Dv, C)
    scale = 1.0 / math.sqrt(Dqk)

    if exp_dtype is None:
        exp_dtype = _default_exp_dtype()

    # Per-head widths padded to lane multiples so in-kernel head slices are
    # aligned (zero padding is exact).
    Dqk_p = _round_up(Dqk, _LANE)
    Dv_p = _round_up(Dv, _LANE)

    # --- wrapper-side layout plumbing (free) ---
    def to_cols(w, Dp, s=1.0):
        Hh, D, _ = w.shape
        wt = jnp.transpose(w, (2, 0, 1)) * s                # (C, H, D)
        wt = jnp.pad(wt, ((0, 0), (0, 0), (0, Dp - D)))
        return wt.reshape(C, Hh * Dp)

    wq_cols = to_cols(w_q, Dqk_p, scale).astype(jnp.bfloat16)   # scale folded into Q
    w_kv = jnp.concatenate([to_cols(w_k, Dqk_p), to_cols(w_v, Dv_p)],
                           axis=1).astype(jnp.bfloat16)
    w_o_p = jnp.pad(w_o.reshape(H, Dv, C),
                    ((0, 0), (0, Dv_p - Dv), (0, 0))
                    ).reshape(H * Dv_p, C).astype(jnp.bfloat16)
    x_b = x.astype(jnp.bfloat16)

    tq = _pick_tile(T)          # query tile == key tile
    n_qblk = T // tq
    n_kv = n_qblk

    kernel = functools.partial(_qkv_attention_kernel, H=H, Dqk_p=Dqk_p, Dv_p=Dv_p,
                               tq=tq, n_kv=n_kv, causal=causal, exp_dtype=exp_dtype)

    flops = 2 * N * (T * C * H * (2 * Dqk_p + Dv_p)        # projections
                     + H * T * T * (Dqk_p + Dv_p)          # attention
                     + T * H * Dv_p * C)                   # output projection
    cost = pl.CostEstimate(
        flops=flops,
        transcendentals=N * H * T * T,
        bytes_accessed=(x_b.size * 2 + wq_cols.size * 2 + w_kv.size * 2
                        + w_o_p.size * 2 + N * T * C * 4))

    grid_spec = pltpu.PrefetchScalarGridSpec(
        num_scalar_prefetch=0,
        grid=(N, n_qblk),
        in_specs=[
            pl.BlockSpec((1, T, C), lambda n, qi: (n, 0, 0)),             # x (per batch)
            pl.BlockSpec((C, H * Dqk_p), lambda n, qi: (0, 0)),           # w_q (resident)
            pl.BlockSpec((C, H * (Dqk_p + Dv_p)), lambda n, qi: (0, 0)),  # w_kv (resident)
            pl.BlockSpec((H * Dv_p, C), lambda n, qi: (0, 0)),            # w_o (resident)
        ],
        out_specs=pl.BlockSpec((1, tq, C), lambda n, qi: (n, qi, 0)),
        scratch_shapes=[
            pltpu.VMEM((T, H * Dqk_p), jnp.bfloat16),   # cached K projection
            pltpu.VMEM((T, H * Dv_p), jnp.bfloat16),    # cached V projection
            pltpu.VMEM((tq, 1), jnp.float32),           # online-softmax max
            pltpu.VMEM((tq, 1), jnp.float32),           # online-softmax sum
            pltpu.VMEM((tq, Dv_p), jnp.float32),        # context accumulator
        ],
    )

    return pl.pallas_call(
        kernel,
        out_shape=jax.ShapeDtypeStruct((N, T, C), jnp.float32),
        grid_spec=grid_spec,
        compiler_params=pltpu.CompilerParams(
            # Batch axis across TensorCores; the q-block axis must stay
            # "arbitrary" because the K/V projection scratch is filled at
            # qi == 0 for each batch element.
            dimension_semantics=("parallel", "arbitrary")),
        cost_estimate=cost,
    )(x_b, wq_cols, w_kv, w_o_p)


def qkv_attention_ref(x, w_q, w_k, w_v, w_o, *, causal=False):
    """Plain-JAX f32 reference matching the PyTorch forward."""
    q = jnp.einsum('ntc,hdc->nhtd', x, w_q)
    k = jnp.einsum('ntc,hdc->nhtd', x, w_k)
    v = jnp.einsum('ntc,hdc->nhtd', x, w_v)
    a = jnp.einsum('nhtd,nhsd->nhts', q, k) / math.sqrt(w_q.shape[1])
    if causal:
        t = jnp.arange(x.shape[1])
        attzero = t[None, None, :, None] < t[None, None, None, :]
        a = jnp.where(attzero, -jnp.inf, a)
    a = jax.nn.softmax(a, axis=3)
    y = jnp.einsum('nhts,nhsd->nthd', a, v).reshape(x.shape[0], x.shape[1], -1)
    return y @ w_o


if __name__ == "__main__":
    # Small shapes consistent with the module: batch=2, seq=16, dim_in=32,
    # dim_qk=16, dim_v=16, nb_heads=2.
    N, T, C = 2, 16, 32
    H, Dqk, Dv = 2, 16, 16

    key = jax.random.PRNGKey(0)
    kx, kq, kk, kv, ko = jax.random.split(key, 5)

    # randw(*d) = randn(*d) / sqrt(d[-1])
    x = jax.random.normal(kx, (N, T, C), dtype=jnp.float32)
    w_q = jax.random.normal(kq, (H, Dqk, C), dtype=jnp.float32) / math.sqrt(C)
    w_k = jax.random.normal(kk, (H, Dqk, C), dtype=jnp.float32) / math.sqrt(C)
    w_v = jax.random.normal(kv, (H, Dv, C), dtype=jnp.float32) / math.sqrt(C)
    w_o = jax.random.normal(ko, (H * Dv, C), dtype=jnp.float32) / math.sqrt(C)

    for causal in (False, True):
        out = qkv_attention(x, w_q, w_k, w_v, w_o, causal=causal)
        out = jax.block_until_ready(out)
        ref = qkv_attention_ref(x, w_q, w_k, w_v, w_o, causal=causal)
        assert out.shape == (N, T, C)
        # Tolerance sized for bf16 MXU operands (f32 accumulation), bf16 exp
        # on v6e/v7x and the approx EUP reciprocal in the softmax.
        assert jnp.allclose(out, ref, atol=5e-2, rtol=5e-2), (
            f"mismatch (causal={causal}), "
            f"max abs err={float(jnp.max(jnp.abs(out - ref)))}")

    print("KERNEL_OK")
</pallas_src>

<mosaic_0001>
module attributes {stable_mosaic.version = 11 : i64} {
  func.func @_qkv_attention_kernel(%arg0: i32, %arg1: i32, %arg2: memref<1x16x32xbf16, #tpu.memory_space<vmem>>, %arg3: memref<32x256xbf16, #tpu.memory_space<vmem>>, %arg4: memref<32x512xbf16, #tpu.memory_space<vmem>>, %arg5: memref<256x32xbf16, #tpu.memory_space<vmem>>, %arg6: memref<1x16x32xf32, #tpu.memory_space<vmem>>, %arg7: memref<16x256xbf16, #tpu.memory_space<vmem>>, %arg8: memref<16x256xbf16, #tpu.memory_space<vmem>>, %arg9: memref<16x1xf32, #tpu.memory_space<vmem>>, %arg10: memref<16x1xf32, #tpu.memory_space<vmem>>, %arg11: memref<16x128xf32, #tpu.memory_space<vmem>>) attributes {dimension_semantics = [#tpu.dimension_semantics<parallel>, #tpu.dimension_semantics<arbitrary>], iteration_bounds = array<i64: 2, 1>, scalar_prefetch = 0 : i64, scratch_operands = 5 : i64, tpu.core_type = #tpu.core_type<tc>, window_params = [{transform_indices = @transform_0, window_bounds = array<i64: 1, 16, 32>}, {pipeline_mode = #tpu.pipeline_mode<synchronous>, transform_indices = @transform_1, window_bounds = array<i64: 32, 256>}, {pipeline_mode = #tpu.pipeline_mode<synchronous>, transform_indices = @transform_2, window_bounds = array<i64: 32, 512>}, {pipeline_mode = #tpu.pipeline_mode<synchronous>, transform_indices = @transform_3, window_bounds = array<i64: 256, 32>}, {transform_indices = @transform_4, window_bounds = array<i64: 1, 16, 32>}]} {
    %c0_i32 = arith.constant 0 : i32
    %0 = arith.cmpi eq, %arg1, %c0_i32 : i32
    %1 = arith.extui %0 : i1 to i32
    %c0_i32_0 = arith.constant 0 : i32
    %2 = arith.cmpi ne, %1, %c0_i32_0 : i32
    scf.if %2 {
      %c0_84 = arith.constant 0 : index
      %c0_85 = arith.constant 0 : index
      %c0_86 = arith.constant 0 : index
      %112 = vector.load %arg2[%c0_84, %c0_85, %c0_86] : memref<1x16x32xbf16, #tpu.memory_space<vmem>>, vector<1x16x32xbf16>
      %113 = vector.shape_cast %112 : vector<1x16x32xbf16> to vector<16x32xbf16>
      %c0_87 = arith.constant 0 : index
      %c0_88 = arith.constant 0 : index
      %114 = vector.load %arg4[%c0_87, %c0_88] : memref<32x512xbf16, #tpu.memory_space<vmem>>, vector<32x512xbf16>
      %cst_89 = arith.constant dense<0.000000e+00> : vector<16x512xf32>
      %115 = tpu.matmul %113, %114, %cst_89 {dimension_numbers = #tpu.dot_dimension_numbers<[1], [0], [0], [1], [0, 0, 1, 1], [], []>} : vector<16x32xbf16>, vector<32x512xbf16>, vector<16x512xf32> -> vector<16x512xf32>
      %116 = vector.extract_strided_slice %115 {offsets = [0, 0], sizes = [16, 256], strides = [1, 1]} : vector<16x512xf32> to vector<16x256xf32>
      %117 = arith.truncf %116 : vector<16x256xf32> to vector<16x256xbf16>
      %c0_90 = arith.constant 0 : index
      %c0_91 = arith.constant 0 : index
      %118 = vector.load %arg7[%c0_90, %c0_91] : memref<16x256xbf16, #tpu.memory_space<vmem>>, vector<16x256xbf16>
      tpu.vector_store %arg7[%c0_90, %c0_91], %117 {strides = array<i32>} : memref<16x256xbf16, #tpu.memory_space<vmem>>, vector<16x256xbf16>,
      %119 = vector.extract_strided_slice %115 {offsets = [0, 256], sizes = [16, 256], strides = [1, 1]} : vector<16x512xf32> to vector<16x256xf32>
      %120 = arith.truncf %119 : vector<16x256xf32> to vector<16x256xbf16>
      %c0_92 = arith.constant 0 : index
      %c0_93 = arith.constant 0 : index
      %121 = vector.load %arg8[%c0_92, %c0_93] : memref<16x256xbf16, #tpu.memory_space<vmem>>, vector<16x256xbf16>
      tpu.vector_store %arg8[%c0_92, %c0_93], %120 {strides = array<i32>} : memref<16x256xbf16, #tpu.memory_space<vmem>>, vector<16x256xbf16>,
    } else {
    }
    %c16_i32 = arith.constant 16 : i32
    %3 = arith.muli %arg1, %c16_i32 : i32
    %4 = tpu.assume_multiple %3, 16 : i32
    %c0 = arith.constant 0 : index
    %5 = arith.index_cast %4 : i32 to index
    %c0_1 = arith.constant 0 : index
    %6 = vector.load %arg2[%c0, %5, %c0_1] : memref<1x16x32xbf16, #tpu.memory_space<vmem>>, vector<1x16x32xbf16>
    %7 = vector.shape_cast %6 : vector<1x16x32xbf16> to vector<16x32xbf16>
    %c0_2 = arith.constant 0 : index
    %c0_3 = arith.constant 0 : index
    %8 = vector.load %arg3[%c0_2, %c0_3] : memref<32x256xbf16, #tpu.memory_space<vmem>>, vector<32x256xbf16>
    %cst = arith.constant dense<0.000000e+00> : vector<16x256xf32>
    %9 = tpu.matmul %7, %8, %cst {dimension_numbers = #tpu.dot_dimension_numbers<[1], [0], [0], [1], [0, 0, 1, 1], [], []>} : vector<16x32xbf16>, vector<32x256xbf16>, vector<16x256xf32> -> vector<16x256xf32>
    %cst_4 = arith.constant 0.000000e+00 : f32
    %10 = vector.broadcast %cst_4 : f32 to vector<16x32xf32>
    %11 = vector.extract_strided_slice %9 {offsets = [0, 0], sizes = [16, 128], strides = [1, 1]} : vector<16x256xf32> to vector<16x128xf32>
    %12 = arith.truncf %11 : vector<16x128xf32> to vector<16x128xbf16>
    %cst_5 = arith.constant 0xFF800000 : f32
    %13 = vector.broadcast %cst_5 : f32 to vector<16x1xf32>
    %c0_6 = arith.constant 0 : index
    %c0_7 = arith.constant 0 : index
    %14 = vector.load %arg9[%c0_6, %c0_7] : memref<16x1xf32, #tpu.memory_space<vmem>>, vector<16x1xf32>
    tpu.vector_store %arg9[%c0_6, %c0_7], %13 {strides = array<i32>} : memref<16x1xf32, #tpu.memory_space<vmem>>, vector<16x1xf32>,
    %cst_8 = arith.constant 0.000000e+00 : f32
    %15 = vector.broadcast %cst_8 : f32 to vector<16x1xf32>
    %c0_9 = arith.constant 0 : index
    %c0_10 = arith.constant 0 : index
    %16 = vector.load %arg10[%c0_9, %c0_10] : memref<16x1xf32, #tpu.memory_space<vmem>>, vector<16x1xf32>
    tpu.vector_store %arg10[%c0_9, %c0_10], %15 {strides = array<i32>} : memref<16x1xf32, #tpu.memory_space<vmem>>, vector<16x1xf32>,
    %cst_11 = arith.constant 0.000000e+00 : f32
    %17 = vector.broadcast %cst_11 : f32 to vector<16x128xf32>
    %c0_12 = arith.constant 0 : index
    %c0_13 = arith.constant 0 : index
    %18 = vector.load %arg11[%c0_12, %c0_13] : memref<16x128xf32, #tpu.memory_space<vmem>>, vector<16x128xf32>
    tpu.vector_store %arg11[%c0_12, %c0_13], %17 {strides = array<i32>} : memref<16x128xf32, #tpu.memory_space<vmem>>, vector<16x128xf32>,
    %c0_i32_14 = arith.constant 0 : i32
    %c1_i32 = arith.constant 1 : i32
    %19 = arith.muli %c0_i32_14, %c1_i32 : i32
    %c0_i32_15 = arith.constant 0 : i32
    %20 = arith.addi %c0_i32_15, %19 : i32
    %c16_i32_16 = arith.constant 16 : i32
    %21 = arith.muli %20, %c16_i32_16 : i32
    %22 = tpu.assume_multiple %21, 16 : i32
    %23 = arith.index_cast %22 : i32 to index
    %c0_17 = arith.constant 0 : index
    %24 = vector.load %arg7[%23, %c0_17] : memref<16x256xbf16, #tpu.memory_space<vmem>>, vector<16x128xbf16>
    %25 = arith.index_cast %22 : i32 to index
    %c0_18 = arith.constant 0 : index
    %26 = vector.load %arg8[%25, %c0_18] : memref<16x256xbf16, #tpu.memory_space<vmem>>, vector<16x128xbf16>
    %cst_19 = arith.constant dense<0.000000e+00> : vector<16x16xf32>
    %27 = tpu.matmul %12, %24, %cst_19 {dimension_numbers = #tpu.dot_dimension_numbers<[1], [1], [0], [0], [0, 0, 1, 0], [], []>} : vector<16x128xbf16>, vector<16x128xbf16>, vector<16x16xf32> -> vector<16x16xf32>
    %c0_20 = arith.constant 0 : index
    %c0_21 = arith.constant 0 : index
    %28 = vector.load %arg9[%c0_20, %c0_21] : memref<16x1xf32, #tpu.memory_space<vmem>>, vector<16x1xf32>
    %cst_22 = arith.constant dense<0xFF800000> : vector<16xf32>
    %29 = vector.multi_reduction <maximumf>, %27, %cst_22 [1] : vector<16x16xf32> to vector<16xf32>
    %30 = vector.shape_cast %29 : vector<16xf32> to vector<16x1xf32>
    %31 = arith.maximumf %28, %30 : vector<16x1xf32>
    %32 = arith.subf %28, %31 : vector<16x1xf32>
    %33 = math.exp %32 : vector<16x1xf32>
    %34 = vector.broadcast %31 : vector<16x1xf32> to vector<16x16xf32>
    %35 = arith.subf %27, %34 : vector<16x16xf32>
    %36 = math.exp %35 : vector<16x16xf32>
    %c0_23 = arith.constant 0 : index
    %c0_24 = arith.constant 0 : index
    %37 = vector.load %arg10[%c0_23, %c0_24] : memref<16x1xf32, #tpu.memory_space<vmem>>, vector<16x1xf32>
    %38 = arith.mulf %33, %37 : vector<16x1xf32>
    %cst_25 = arith.constant dense<0.000000e+00> : vector<16xf32>
    %39 = vector.multi_reduction <add>, %36, %cst_25 [1] : vector<16x16xf32> to vector<16xf32>
    %40 = vector.shape_cast %39 : vector<16xf32> to vector<16x1xf32>
    %41 = arith.addf %38, %40 : vector<16x1xf32>
    %c0_26 = arith.constant 0 : index
    %c0_27 = arith.constant 0 : index
    %42 = vector.load %arg10[%c0_26, %c0_27] : memref<16x1xf32, #tpu.memory_space<vmem>>, vector<16x1xf32>
    tpu.vector_store %arg10[%c0_26, %c0_27], %41 {strides = array<i32>} : memref<16x1xf32, #tpu.memory_space<vmem>>, vector<16x1xf32>,
    %c0_28 = arith.constant 0 : index
    %c0_29 = arith.constant 0 : index
    %43 = vector.load %arg11[%c0_28, %c0_29] : memref<16x128xf32, #tpu.memory_space<vmem>>, vector<16x128xf32>
    %44 = vector.broadcast %33 : vector<16x1xf32> to vector<16x128xf32>
    %45 = arith.mulf %44, %43 : vector<16x128xf32>
    %46 = arith.truncf %36 : vector<16x16xf32> to vector<16x16xbf16>
    %cst_30 = arith.constant dense<0.000000e+00> : vector<16x128xf32>
    %47 = tpu.matmul %46, %26, %cst_30 {dimension_numbers = #tpu.dot_dimension_numbers<[1], [0], [0], [1], [0, 0, 1, 1], [], []>} : vector<16x16xbf16>, vector<16x128xbf16>, vector<16x128xf32> -> vector<16x128xf32>
    %48 = arith.addf %45, %47 : vector<16x128xf32>
    %c0_31 = arith.constant 0 : index
    %c0_32 = arith.constant 0 : index
    %49 = vector.load %arg11[%c0_31, %c0_32] : memref<16x128xf32, #tpu.memory_space<vmem>>, vector<16x128xf32>
    tpu.vector_store %arg11[%c0_31, %c0_32], %48 {strides = array<i32>} : memref<16x128xf32, #tpu.memory_space<vmem>>, vector<16x128xf32>,
    %c0_33 = arith.constant 0 : index
    %c0_34 = arith.constant 0 : index
    %50 = vector.load %arg9[%c0_33, %c0_34] : memref<16x1xf32, #tpu.memory_space<vmem>>, vector<16x1xf32>
    tpu.vector_store %arg9[%c0_33, %c0_34], %31 {strides = array<i32>} : memref<16x1xf32, #tpu.memory_space<vmem>>, vector<16x1xf32>,
    %c1_i32_35 = arith.constant 1 : i32
    %c0_36 = arith.constant 0 : index
    %c0_37 = arith.constant 0 : index
    %51 = vector.load %arg11[%c0_36, %c0_37] : memref<16x128xf32, #tpu.memory_space<vmem>>, vector<16x128xf32>
    %c0_38 = arith.constant 0 : index
    %c0_39 = arith.constant 0 : index
    %52 = vector.load %arg10[%c0_38, %c0_39] : memref<16x1xf32, #tpu.memory_space<vmem>>, vector<16x1xf32>
    %53 = tpu.reciprocal %52 {approx = true} : vector<16x1xf32> -> vector<16x1xf32>
    %54 = vector.broadcast %53 : vector<16x1xf32> to vector<16x128xf32>
    %55 = arith.mulf %51, %54 : vector<16x128xf32>
    %56 = arith.truncf %55 : vector<16x128xf32> to vector<16x128xbf16>
    %c0_40 = arith.constant 0 : index
    %c0_41 = arith.constant 0 : index
    %57 = vector.load %arg5[%c0_40, %c0_41] : memref<256x32xbf16, #tpu.memory_space<vmem>>, vector<128x32xbf16>
    %cst_42 = arith.constant dense<0.000000e+00> : vector<16x32xf32>
    %58 = tpu.matmul %56, %57, %cst_42 {dimension_numbers = #tpu.dot_dimension_numbers<[1], [0], [0], [1], [0, 0, 1, 1], [], []>} : vector<16x128xbf16>, vector<128x32xbf16>, vector<16x32xf32> -> vector<16x32xf32>
    %59 = arith.addf %10, %58 : vector<16x32xf32>
    %60 = vector.extract_strided_slice %9 {offsets = [0, 128], sizes = [16, 128], strides = [1, 1]} : vector<16x256xf32> to vector<16x128xf32>
    %61 = arith.truncf %60 : vector<16x128xf32> to vector<16x128xbf16>
    %cst_43 = arith.constant 0xFF800000 : f32
    %62 = vector.broadcast %cst_43 : f32 to vector<16x1xf32>
    %c0_44 = arith.constant 0 : index
    %c0_45 = arith.constant 0 : index
    %63 = vector.load %arg9[%c0_44, %c0_45] : memref<16x1xf32, #tpu.memory_space<vmem>>, vector<16x1xf32>
    tpu.vector_store %arg9[%c0_44, %c0_45], %62 {strides = array<i32>} : memref<16x1xf32, #tpu.memory_space<vmem>>, vector<16x1xf32>,
    %cst_46 = arith.constant 0.000000e+00 : f32
    %64 = vector.broadcast %cst_46 : f32 to vector<16x1xf32>
    %c0_47 = arith.constant 0 : index
    %c0_48 = arith.constant 0 : index
    %65 = vector.load %arg10[%c0_47, %c0_48] : memref<16x1xf32, #tpu.memory_space<vmem>>, vector<16x1xf32>
    tpu.vector_store %arg10[%c0_47, %c0_48], %64 {strides = array<i32>} : memref<16x1xf32, #tpu.memory_space<vmem>>, vector<16x1xf32>,
    %cst_49 = arith.constant 0.000000e+00 : f32
    %66 = vector.broadcast %cst_49 : f32 to vector<16x128xf32>
    %c0_50 = arith.constant 0 : index
    %c0_51 = arith.constant 0 : index
    %67 = vector.load %arg11[%c0_50, %c0_51] : memref<16x128xf32, #tpu.memory_space<vmem>>, vector<16x128xf32>
    tpu.vector_store %arg11[%c0_50, %c0_51], %66 {strides = array<i32>} : memref<16x128xf32, #tpu.memory_space<vmem>>, vector<16x128xf32>,
    %c0_i32_52 = arith.constant 0 : i32
    %c1_i32_53 = arith.constant 1 : i32
    %68 = arith.muli %c0_i32_52, %c1_i32_53 : i32
    %c0_i32_54 = arith.constant 0 : i32
    %69 = arith.addi %c0_i32_54, %68 : i32
    %c16_i32_55 = arith.constant 16 : i32
    %70 = arith.muli %69, %c16_i32_55 : i32
    %71 = tpu.assume_multiple %70, 16 : i32
    %72 = arith.index_cast %71 : i32 to index
    %c128 = arith.constant 128 : index
    %73 = vector.load %arg7[%72, %c128] : memref<16x256xbf16, #tpu.memory_space<vmem>>, vector<16x128xbf16>
    %74 = arith.index_cast %71 : i32 to index
    %c128_56 = arith.constant 128 : index
    %75 = vector.load %arg8[%74, %c128_56] : memref<16x256xbf16, #tpu.memory_space<vmem>>, vector<16x128xbf16>
    %cst_57 = arith.constant dense<0.000000e+00> : vector<16x16xf32>
    %76 = tpu.matmul %61, %73, %cst_57 {dimension_numbers = #tpu.dot_dimension_numbers<[1], [1], [0], [0], [0, 0, 1, 0], [], []>} : vector<16x128xbf16>, vector<16x128xbf16>, vector<16x16xf32> -> vector<16x16xf32>
    %c0_58 = arith.constant 0 : index
    %c0_59 = arith.constant 0 : index
    %77 = vector.load %arg9[%c0_58, %c0_59] : memref<16x1xf32, #tpu.memory_space<vmem>>, vector<16x1xf32>
    %cst_60 = arith.constant dense<0xFF800000> : vector<16xf32>
    %78 = vector.multi_reduction <maximumf>, %76, %cst_60 [1] : vector<16x16xf32> to vector<16xf32>
    %79 = vector.shape_cast %78 : vector<16xf32> to vector<16x1xf32>
    %80 = arith.maximumf %77, %79 : vector<16x1xf32>
    %81 = arith.subf %77, %80 : vector<16x1xf32>
    %82 = math.exp %81 : vector<16x1xf32>
    %83 = vector.broadcast %80 : vector<16x1xf32> to vector<16x16xf32>
    %84 = arith.subf %76, %83 : vector<16x16xf32>
    %85 = math.exp %84 : vector<16x16xf32>
    %c0_61 = arith.constant 0 : index
    %c0_62 = arith.constant 0 : index
    %86 = vector.load %arg10[%c0_61, %c0_62] : memref<16x1xf32, #tpu.memory_space<vmem>>, vector<16x1xf32>
    %87 = arith.mulf %82, %86 : vector<16x1xf32>
    %cst_63 = arith.constant dense<0.000000e+00> : vector<16xf32>
    %88 = vector.multi_reduction <add>, %85, %cst_63 [1] : vector<16x16xf32> to vector<16xf32>
    %89 = vector.shape_cast %88 : vector<16xf32> to vector<16x1xf32>
    %90 = arith.addf %87, %89 : vector<16x1xf32>
    %c0_64 = arith.constant 0 : index
    %c0_65 = arith.constant 0 : index
    %91 = vector.load %arg10[%c0_64, %c0_65] : memref<16x1xf32, #tpu.memory_space<vmem>>, vector<16x1xf32>
    tpu.vector_store %arg10[%c0_64, %c0_65], %90 {strides = array<i32>} : memref<16x1xf32, #tpu.memory_space<vmem>>, vector<16x1xf32>,
    %c0_66 = arith.constant 0 : index
    %c0_67 = arith.constant 0 : index
    %92 = vector.load %arg11[%c0_66, %c0_67] : memref<16x128xf32, #tpu.memory_space<vmem>>, vector<16x128xf32>
    %93 = vector.broadcast %82 : vector<16x1xf32> to vector<16x128xf32>
    %94 = arith.mulf %93, %92 : vector<16x128xf32>
    %95 = arith.truncf %85 : vector<16x16xf32> to vector<16x16xbf16>
    %cst_68 = arith.constant dense<0.000000e+00> : vector<16x128xf32>
    %96 = tpu.matmul %95, %75, %cst_68 {dimension_numbers = #tpu.dot_dimension_numbers<[1], [0], [0], [1], [0, 0, 1, 1], [], []>} : vector<16x16xbf16>, vector<16x128xbf16>, vector<16x128xf32> -> vector<16x128xf32>
    %97 = arith.addf %94, %96 : vector<16x128xf32>
    %c0_69 = arith.constant 0 : index
    %c0_70 = arith.constant 0 : index
    %98 = vector.load %arg11[%c0_69, %c0_70] : memref<16x128xf32, #tpu.memory_space<vmem>>, vector<16x128xf32>
    tpu.vector_store %arg11[%c0_69, %c0_70], %97 {strides = array<i32>} : memref<16x128xf32, #tpu.memory_space<vmem>>, vector<16x128xf32>,
    %c0_71 = arith.constant 0 : index
    %c0_72 = arith.constant 0 : index
    %99 = vector.load %arg9[%c0_71, %c0_72] : memref<16x1xf32, #tpu.memory_space<vmem>>, vector<16x1xf32>
    tpu.vector_store %arg9[%c0_71, %c0_72], %80 {strides = array<i32>} : memref<16x1xf32, #tpu.memory_space<vmem>>, vector<16x1xf32>,
    %c1_i32_73 = arith.constant 1 : i32
    %c0_74 = arith.constant 0 : index
    %c0_75 = arith.constant 0 : index
    %100 = vector.load %arg11[%c0_74, %c0_75] : memref<16x128xf32, #tpu.memory_space<vmem>>, vector<16x128xf32>
    %c0_76 = arith.constant 0 : index
    %c0_77 = arith.constant 0 : index
    %101 = vector.load %arg10[%c0_76, %c0_77] : memref<16x1xf32, #tpu.memory_space<vmem>>, vector<16x1xf32>
    %102 = tpu.reciprocal %101 {approx = true} : vector<16x1xf32> -> vector<16x1xf32>
    %103 = vector.broadcast %102 : vector<16x1xf32> to vector<16x128xf32>
    %104 = arith.mulf %100, %103 : vector<16x128xf32>
    %105 = arith.truncf %104 : vector<16x128xf32> to vector<16x128xbf16>
    %c128_78 = arith.constant 128 : index
    %c0_79 = arith.constant 0 : index
    %106 = vector.load %arg5[%c128_78, %c0_79] : memref<256x32xbf16, #tpu.memory_space<vmem>>, vector<128x32xbf16>
    %cst_80 = arith.constant dense<0.000000e+00> : vector<16x32xf32>
    %107 = tpu.matmul %105, %106, %cst_80 {dimension_numbers = #tpu.dot_dimension_numbers<[1], [0], [0], [1], [0, 0, 1, 1], [], []>} : vector<16x128xbf16>, vector<128x32xbf16>, vector<16x32xf32> -> vector<16x32xf32>
    %108 = arith.addf %59, %107 : vector<16x32xf32>
    %c0_81 = arith.constant 0 : index
    %c0_82 = arith.constant 0 : index
    %c0_83 = arith.constant 0 : index
    %109 = vector.load %arg6[%c0_81, %c0_82, %c0_83] : memref<1x16x32xf32, #tpu.memory_space<vmem>>, vector<1x16x32xf32>
    %110 = vector.shape_cast %109 : vector<1x16x32xf32> to vector<16x32xf32>
    %111 = vector.shape_cast %108 : vector<16x32xf32> to vector<1x16x32xf32>
    tpu.vector_store %arg6[%c0_81, %c0_82, %c0_83], %111 {strides = array<i32>} : memref<1x16x32xf32, #tpu.memory_space<vmem>>, vector<1x16x32xf32>,
    return
  }
  func.func @transform_0(%arg0: i32, %arg1: i32) -> (i32, i32, i32) {
    %c0_i32 = arith.constant 0 : i32
    %c0_i32_0 = arith.constant 0 : i32
    %c0_i32_1 = arith.constant 0 : i32
    return %arg0, %c0_i32, %c0_i32_0 : i32, i32, i32
  }
  func.func @transform_1(%arg0: i32, %arg1: i32) -> (i32, i32) {
    %c0_i32 = arith.constant 0 : i32
    %c0_i32_0 = arith.constant 0 : i32
    %c0_i32_1 = arith.constant 0 : i32
    return %c0_i32, %c0_i32_0 : i32, i32
  }
  func.func @transform_2(%arg0: i32, %arg1: i32) -> (i32, i32) {
    %c0_i32 = arith.constant 0 : i32
    %c0_i32_0 = arith.constant 0 : i32
    %c0_i32_1 = arith.constant 0 : i32
    return %c0_i32, %c0_i32_0 : i32, i32
  }
  func.func @transform_3(%arg0: i32, %arg1: i32) -> (i32, i32) {
    %c0_i32 = arith.constant 0 : i32
    %c0_i32_0 = arith.constant 0 : i32
    %c0_i32_1 = arith.constant 0 : i32
    return %c0_i32, %c0_i32_0 : i32, i32
  }
  func.func @transform_4(%arg0: i32, %arg1: i32) -> (i32, i32, i32) {
    %c0_i32 = arith.constant 0 : i32
    %c0_i32_0 = arith.constant 0 : i32
    return %arg0, %arg1, %c0_i32 : i32, i32, i32
  }
}

</mosaic_0001>

<bundles_post_ra>
// kernel: tpu_custom_call.1
= control target key start
LH: loop header
LB: loop body
LE: loop exit
PB: predicated region body
PF: predicated region fallthrough
CT: control target
= control target key end

     0   :  { %9 = vsyncpa [#allocation8], 0  ;;  %s1778_s0 = inlined_call_operand.vmem [shape: bf16[2,16,32], index: 0, kind: input, shape index: {}]   ;;  %s1779_s1 = inlined_call_operand.vmem [shape: bf16[32,256], index: 1, kind: input, shape index: {}]   ;;  %s1780_s2 = inlined_call_operand.vmem [shape: bf16[32,512], index: 2, kind: input, shape index: {}]   ;;  %s1781_s3 = inlined_call_operand.vmem [shape: bf16[256,32], index: 3, kind: input, shape index: {}]   ;;  %s1782_s4 = inlined_call_operand.hbm [shape: f32[2,16,32], index: 4, kind: output, shape index: {}]  }
   0x1   :  { %11 = vsyncpa [#allocation8 + $0x1], 0  ;;  %s1499_s15 = smov 0   ;;  %s1501_s16 = smov 0  }
   0x2   :  { %s1503_s17 = smov 0   ;;  %s1505_s18 = smov 0  }
   0x3   :  { %s1507_s19 = smov 0   ;;  %s1509_s20 = smov 0  }
   0x4 LB: > { %s1122_s21 = sadd.s32 4294967295, %s1465_s20   ;;  %s1123_s22 = sadd.s32 4294967294, %s1465_s20   ;;  %s1465_s20 = sphi %s1509_s20, %s17_s20   ;;  %s1461_s19 = sphi %s1507_s19, %s1789_s19   ;;  %s1457_s18 = sphi %s1505_s18, %s1788_s18   ;;  %s1453_s17 = sphi %s1503_s17, %s1787_s17   ;;  %s1449_s16 = sphi %s1501_s16, %s1786_s16   ;;  %s1445_s15 = sphi %s1499_s15, %s1785_s15  }
   0x5   : > { %s29_s23 = sadd.s32 1, %s1461_s19  ;;  %s127_s24 = sadd.s32 1, %s1453_s17 }
   0x6   : > { %p31_p0 = scmp.ge.s32.totalorder %s29_s23, 2  ;;  %p137_p1 = scmp.ne.s32.totalorder %s1453_s17, %s1449_s16 }
   0x7   : > { %p138_p2 = scmp.eq.s32.totalorder %s1122_s21, 1  ;;  %p143_p3 = scmp.ne.s32.totalorder %s1449_s16, %s1445_s15 }
   0x8   : > { %s1791_s23 = smov (%p31_p0, %s29_s23), 0  ;;  %p144_p5 = scmp.eq.s32.totalorder %s1123_s22, 1 }
   0x9   : > { %p1539_p4 = por %p138_p2, %p137_p1  ;;  %s122_s26 = ssub.s32 %s1461_s19, %s1791_s23 }
   0xa   : > { %p1126_p6 = scmp.ge.s32.totalorder %s1465_s20, 1  ;;  %p125_p7 = scmp.eq.s32.totalorder %s122_s26, 0 }
   0xb   : > { %p1546_p8 = por %p144_p5, %p143_p3  ;;  %p179_p9 = scmp.lt.s32.totalorder %s1465_s20, 3 }
   0xc   : > { %s1552_s28 = scalar_select %p125_p7, %s1453_s17, %s127_s24  }
   0xd   : > { %p180_p10 = pnand %p1126_p6, %p179_p9 }
   0xe   : > { %v1327_v0 = vld [vmem:[%s1780_s2 + $0x4] ss:$16 sps:$4 sm:$0xff] (!%p180_p10)   ;;  %p205_p11 = scmp.lt.s32.totalorder (!%p180_p10), %s1457_s18, 1  ;;  %v1329_v1 = vld [vmem:[%s1780_s2] ss:$16 sps:$4 sm:$0xff] (!%p180_p10)   ;;  %v1467_v2 = vmov (!%p180_p10), 0  }
   0xf   : > { %183 = sbr.rel (%p180_p10) target bundleno = 1302 (0x516), region = 36  ;;  %307 = vmatprep.mubr.bf16.mxu0 (!%p180_p10), %v1467_v2  ;;  %350 = vmatprep.mubr.bf16.mxu1 (!%p180_p10), %v1467_v2  ;;  %v1330_v3 = vld [vmem:[%s1780_s2 + $0x24] ss:$16 sps:$4 sm:$0xff] (!%p180_p10)   ;;  %v1332_v4 = vld [vmem:[%s1780_s2 + $0x20] ss:$16 sps:$4 sm:$0xff] (!%p180_p10)   ;;  %vm271_vm0 = vcmask (!%p180_p10), 261120  }
  0x10   : > { %275 = vmatprep.subr.bf16.mxu0 (!%p180_p10), %v1327_v0  ;;  %1325 = vset.pattern.permute.xlu0 (!%p180_p10), %v1467_v2  ;;  %v1336_v5 = vld [vmem:[%s1779_s1 + $0x4] ss:$8 sps:$4 sm:$0xff] (!%p180_p10)   ;;  %v1334_v6 = vld [vmem:[%s1779_s1] ss:$8 sps:$4 sm:$0xff] (!%p180_p10)   ;;  %v1339_v8 = vld [vmem:[%s1779_s1 + $0x14] ss:$8 sps:$4 sm:$0xff] (!%p180_p10)  }
  0x11   : > { %276 = vmatpush1.bf16.msra.mxu0 (!%p180_p10), %v1329_v1  ;;  %1326 = vset.pattern.permute.xlu1 (!%p180_p10), %v1467_v2  ;;  %v1341_v9 = vld [vmem:[%s1780_s2 + $0xc] ss:$16 sps:$4 sm:$0xff] (!%p180_p10)   ;;  %v1343_v10 = vld [vmem:[%s1780_s2 + $0x8] ss:$16 sps:$4 sm:$0xff] (!%p180_p10)   ;;  %v1468_v15 = vmov (!%p180_p10), 0.0   ;;  %vm1469_vm1 = vmmov (!%p180_p10), 0  }
  0x12   : > { %277 = vmatprep.subr.bf16.mxu0 (!%p180_p10), %v1330_v3  ;;  %v1337_v11 = vld [vmem:[%s1779_s1 + $0x10] ss:$8 sps:$4 sm:$0xff] (!%p180_p10)   ;;  %v1344_v12 = vld [vmem:[%s1780_s2 + $0x2c] ss:$16 sps:$4 sm:$0xff] (!%p180_p10)   ;;  %318 = vmatprep.subr.bf16.mxu1 (!%p180_p10), %v1341_v9  ;;  %vm453_vm2 = vcmask (!%p180_p10), 7168   ;;  %v1470_v34 = vmov (!%p180_p10), -inf  }
  0x13   : > { %v1346_v13 = vld [vmem:[%s1780_s2 + $0x28] ss:$16 sps:$4 sm:$0xff] (!%p180_p10)   ;;  %319 = vmatpush1.bf16.msra.mxu1 (!%p180_p10), %v1343_v10  ;;  %454 = vst.msk [vmem:[#allocation4] sm:$0xff] (!%p180_p10), %vm453_vm2, %v1470_v34  ;;  %455 = vst.msk [vmem:[#allocation4 + $0x8] sm:$0xff] (!%p180_p10), %vm453_vm2, %v1470_v34  ;;  %vm510_vm3 = vcmask (!%p180_p10), 130048   ;;  %s202_s22 = sand.u32 (!%p180_p10), 1, %s1449_s16  }
  0x14   : > { %320 = vmatprep.subr.bf16.mxu1 (!%p180_p10), %v1344_v12  ;;  %456 = vst.msk [vmem:[#allocation5] sm:$0xff] (!%p180_p10), %vm453_vm2, %v1468_v15  ;;  %457 = vst.msk [vmem:[#allocation5 + $0x8] sm:$0xff] (!%p180_p10), %vm453_vm2, %v1468_v15  ;;  %s1171_s30 = sshll.u32 (!%p180_p10), %s1457_s18, 8 }
  0x15   : > { %278 = vmatpush1.bf16.msra.mxu0 (!%p180_p10), %v1332_v4  ;;  %s1729_s7 = scalar_lea.hbm (!%p180_p10), %s1782_s4, %s1171_s30 }
  0x16   : > { %s206_s9 = scalar_select %p205_p11, %s1457_s18, 1  ;;  %409 = vmatprep.subr.bf16.mxu0 %v1336_v5 }
  0x17   : > { %321 = vmatpush1.bf16.msra.mxu1 %v1346_v13  ;;  %s1732_s18 = scalar_lea.sflag [#allocation8], %s202_s22 }
  0x18   : > { %s1170_s12 = sshll.u32 %s206_s9, 3  ;;  %1198 = vmatprep.subr.bf16.mxu1 %v1468_v15  ;;  %s1471_s9 = smov [#allocation7]  }
  0x19   : > { %s209_s24 = scalar_lea.vmem %s1778_s0, %s1170_s12  ;;  %s1391_s10 = sshll.u32 %s1471_s9, 4  ;;  %s1392_s10 = int_to_ptr.vmem [resolvable:$false] %s1391_s10 }
  0x1a   : > { %v1333_v7 = vld [vmem:[%s209_s24] sm:$0xff]   ;;  %v509_v50 = vld [vmem:[#allocation4 + $0x8] sm:$0xff]  ;;  %s1393_s11 = scalar_lea.vmem %s1392_s10, 512 }
  0x1b   : > { %1139 = vmatmul.mubr.msk.bf16.vlgmr.msra.gmra.mrb[0].mxu0 %vm271_vm0, %v1333_v7  ;;  %v1340_v14 = vld [vmem:[%s209_s24] sm:$0xff]   ;;  %1140 = vmatmul.mubr.msk.bf16.vlgmr.msra.gmra.mrb[0].mxu1 %vm271_vm0, %v1333_v7  ;;  %s1127_s24 = sshll.u32 %s202_s22, 4 }
  0x1c   : > { %410 = vmatpush1.bf16.msra.mxu0 %v1334_v6  ;;  %441 = vmatprep.mubr.bf16.mxu0 %v1467_v2  ;;  %v1627_v47 = vld [vmem:[#allocation4] sm:$0xff]  ;;  %s204_s26 = scalar_lea.vmem [#allocation7], %s1127_s24 }
  0x1d   : > { %411 = vmatprep.subr.bf16.mxu0 %v1339_v8  ;;  %1200 = vmatprep.mubr.msk.bf16.mxu1 %vm1469_vm1, %v1468_v15  ;;  %s1047_s29 = sshll.u32 %s204_s26, 4  ;;  %s1723_s29 = int_to_ptr.vmem [resolvable:$true] %s1047_s29 }
  0x1e   : > { %s1387_s8 = scalar_lea.vmem %s1723_s29, 256  ;;  %p1394_p1 = scmp.lt.s32.totalorder %s1723_s29, %s1392_s10 }
  0x1f   : > { %p1388_p12 = scmp.ne.s32.totalorder %s1723_s29, %s1387_s8  ;;  %p1395_p2 = scmp.lt.s32.totalorder %s1393_s11, %s1387_s8 }
  0x20   : > { %412 = vmatpush1.bf16.msra.mxu0 %v1337_v11 }
  0x21   : > { %1204 = vmatprep.subr.bf16.mxu0 %v1468_v15  ;;  %p1389_p13 = pnand %p1388_p12, %p1539_p4  ;;  %p1396_p3 = por %p1395_p2, %p1394_p1 }
  0x23   : > { %1146 = vmatmul.mubr.msk.bf16.vlgmr.msra.gmra.mrb[4].mxu0 %vm271_vm0, %v1340_v14  ;;  %p1390_p0 = pneg %p1389_p13 }
  0x24   : > { %1206 = vmatprep.mubr.msk.bf16.mxu0 %vm1469_vm1, %v1468_v15 }
  0x25   : > { %p1397_p5 = pnand %p1396_p3, %p1390_p0 }
  0xee   : > { %v309_v16 = vpop.f32.mrb[0].mxu0  ;;  %v352_v24 = vpop.f32.mrb[0].mxu1 }
  0xef   : > { %v311_v17 = vpop.f32.mrb[1].mxu0  ;;  %v1605_v26 = vpop.f32.mrb[1].mxu1 }
  0xf0   : > { %v313_v18 = vpop.f32.mrb[2].mxu0  ;;  %v356_v29 = vpop.f32.mrb[2].mxu1 }
  0xf1   : > { %v361_v19 = vpack.c.bf16 %v313_v18, %v309_v16  ;;  %v315_v20 = vpop.f32.mrb[3].mxu0  ;;  %v365_v31 = vpack.c.bf16 %v356_v29, %v352_v24  ;;  %v1607_v32 = vpop.f32.mrb[3].mxu1 }
  0xf2   : > { %v362_v21 = vpack.c.bf16 %v315_v20, %v311_v17  ;;  %v366_v33 = vpack.c.bf16 %v1607_v32, %v1605_v26  ;;  %v1348_v32 = vld [vmem:[%s1781_s3 + $0x8] sm:$0xff]  }
  0xf3   : > { %1199 = vmatpush3.bf16.xpose.msra.mxu1 %v361_v19  ;;  %1205 = vmatpush3.bf16.msra.mxu0 %v365_v31  ;;  %v1352_v31 = vld [vmem:[%s1781_s3 + $0x40] sm:$0xff]  }
  0xf4   : > { %1210 = vmatprep.subr.bf16.mxu1 %v1468_v15  ;;  %1216 = vmatprep.subr.bf16.mxu0 %v1468_v15 }
  0xf6   : > { %v443_v22 = vpop.f32.mrb[4].mxu0 }
  0xf7   : > { %v445_v23 = vpop.f32.mrb[5].mxu0 }
  0xf8   : > { %v447_v25 = vpop.f32.mrb[6].mxu0 }
  0xf9   : > { %v452_v27 = vpack.c.bf16 %v447_v25, %v443_v22  ;;  %v449_v28 = vpop.f32.mrb[7].mxu0 }
  0xfa   : > { %v655_v30 = vpack.c.bf16 %v449_v28, %v445_v23 }
  0xfb   : > { %1201 = vmatmul.mubr.bf16.vlgmr.msra.gmra.mrb[4].mxu1 %v452_v27 }
  0xfc   : > { %1211 = vmatpush3.bf16.xpose.msra.mxu1 %v362_v21  ;;  %1212 = vmatprep.mubr.msk.bf16.mxu1 %vm1469_vm1, %v1468_v15 }
  0xfd   : > { %1242 = vmatprep.subr.bf16.mxu1 %v1468_v15 }
 0x103   : > { %1213 = vmatmul.mubr.bf16.vlgmr.msra.gmra.mrb[8].mxu1 %v655_v30  ;;  %v1347_v30 = vld [vmem:[%s1781_s3] sm:$0xff]  }
 0x104   : > { %1258 = vmatprep.mubr.msk.bf16.mxu1 %vm1469_vm1, %v1468_v15  ;;  %1243 = vmatpush3.bf16.msra.mxu1 %v1347_v30 }
 0x105   : > { %1244 = vmatprep.subr.bf16.mxu1 %v1468_v15 }
 0x108   : > { %1245 = vmatpush3.bf16.msra.mxu1 %v1348_v32 }
 0x109   : > { %1246 = vmatprep.subr.bf16.mxu1 %v1468_v15 }
 0x1ce   : > { %v501_v35 = vpop.f32.mrb[4].mxu1 }
 0x1cf   : > { %v1202_v36 = vpop.f32.mrb[5].mxu1  ;;  %v511_v37 = vsel %vm510_vm3, %v501_v35, -inf }
 0x1d0   : > { %512 = vmax.xlane.f32.xlu0 %v511_v37  ;;  %v504_v38 = vpop.f32.mrb[6].mxu1  ;;  %v1353_v36 = vld [vmem:[%s1781_s3 + $0x28] sm:$0xff]   ;;  %v541_v37 = vld [vmem:[#allocation5] sm:$0xff] }
 0x1d1   : > { %v1203_v39 = vpop.f32.mrb[7].mxu1  ;;  %v514_v40 = vsel %vm510_vm3, %v504_v38, -inf }
 0x1d4   : > { %515 = vmax.xlane.f32.xlu0 %v514_v40  ;;  %v542_v40 = vld [vmem:[#allocation5 + $0x8] sm:$0xff] }
 0x1d6   : > { %v698_v41 = vpop.f32.mrb[8].mxu1 }
 0x1d7   : > { %v1214_v42 = vpop.f32.mrb[9].mxu1  ;;  %v707_v43 = vsel %vm510_vm3, %v698_v41, -inf }
 0x1d8   : > { %708 = vmax.xlane.f32.xlu1 %v707_v43  ;;  %v701_v44 = vpop.f32.mrb[10].mxu1 }
 0x1d9   : > { %v1215_v45 = vpop.f32.mrb[11].mxu1  ;;  %v710_v46 = vsel %vm510_vm3, %v701_v44, -inf }
 0x1dc   : > { %711 = vmax.xlane.f32.xlu1 %v710_v46 }
 0x25d   : > { %v513_v48 = vpop.xlane.xlu0 %512 }
 0x25e   : > { %v517_v49 = vmax.f32 %v1627_v47, %v513_v48 }
 0x260   : > { %v519_v51 = vsub.f32 %v1627_v47, %v517_v49  ;;  %618 = vst.msk [vmem:[#allocation4] sm:$0xff] %vm453_vm2, %v517_v49  ;;  %527 = vperm.xlu0 %1325, %v517_v49  }
 0x261   : > { %656 = vst.msk [vmem:[#allocation4] sm:$0xff] %vm453_vm2, %v1470_v34  ;;  %v516_v52 = vpop.xlane.xlu0 %515 }
 0x262   : > { %v518_v53 = vmax.f32 %v509_v50, %v516_v52  ;;  %v521_v23 = vmul.f32 1.442695, %v519_v51 }
 0x264   : > { %v520_v54 = vsub.f32 %v509_v50, %v518_v53  ;;  %619 = vst.msk [vmem:[#allocation4 + $0x8] sm:$0xff] %vm453_vm2, %v518_v53  ;;  %532 = vperm.xlu1 %1326, %v518_v53   ;;  %v1354_v53 = vld [vmem:[%s1781_s3 + $0x48] sm:$0xff]  }
 0x265   : > { %657 = vst.msk [vmem:[#allocation4 + $0x8] sm:$0xff] %vm453_vm2, %v1470_v34  ;;  %v709_v55 = vpop.xlane.xlu1 %708  ;;  %v1350_v34 = vld [vmem:[%s1781_s3 + $0x18] sm:$0xff]  }
 0x266   : > { %v523_v19 = vmul.f32 1.442695, %v520_v54  ;;  %v1355_v54 = vld [vmem:[%s1781_s3 + $0x30] sm:$0xff]  }
 0x268   : > { %v705_v56 = vld [vmem:[#allocation4] sm:$0xff] }
 0x269   : > { %v713_v57 = vmax.f32 %v705_v56, %v709_v55  ;;  %v712_v60 = vpop.xlane.xlu1 %711 }
 0x26b   : > { %v715_v58 = vsub.f32 %v705_v56, %v713_v57  ;;  %814 = vst.msk [vmem:[#allocation4] sm:$0xff] %vm453_vm2, %v713_v57  ;;  %723 = vperm.xlu1 %1326, %v713_v57  }
 0x26c   : > { %v706_v59 = vld [vmem:[#allocation4 + $0x8] sm:$0xff] }
 0x26d   : > { %v714_v61 = vmax.f32 %v706_v59, %v712_v60  ;;  %v717_v24 = vmul.f32 1.442695, %v715_v58  ;;  %v1357_v60 = vld [vmem:[%s1781_s3 + $0x38] sm:$0xff]  }
 0x26f   : > { %v716_v62 = vsub.f32 %v706_v59, %v714_v61  ;;  %815 = vst.msk [vmem:[#allocation4 + $0x8] sm:$0xff] %vm453_vm2, %v714_v61  ;;  %728 = vperm.xlu1 %1326, %v714_v61   ;;  %v1356_v59 = vld [vmem:[%s1781_s3 + $0x50] sm:$0xff]  }
 0x271   : > { %v719_v26 = vmul.f32 1.442695, %v716_v62  ;;  %v1358_v62 = vld [vmem:[%s1781_s3 + $0x58] sm:$0xff]  }
 0x2df   : > { %v528_v63 = vpop.permute.xlu0 %527 }
 0x2e0   : > { %v535_v0 = vsub.f32 %v501_v35, %v528_v63  ;;  %v1351_v35 = vld [vmem:[%s1781_s3 + $0x20] sm:$0xff]  }
 0x2e1   : > { %v1359_v63 = vld [vmem:[%s1781_s3 + $0x60] sm:$0xff]  }
 0x2e2   : > { %v537_v1 = vmul.f32 1.442695, %v535_v0 }
 0x2e3   : > { %v533_v2 = vpop.permute.xlu1 %532 }
 0x2e4   : > { %1363 = vpow2.f32 %v537_v1  ;;  %v536_v3 = vsub.f32 %v504_v38, %v533_v2  ;;  %v1360_v1 = vld [vmem:[%s1781_s3 + $0x68] sm:$0xff]  }
 0x2e6   : > { %v539_v4 = vmul.f32 1.442695, %v536_v3  ;;  %v1361_v3 = vld [vmem:[%s1781_s3 + $0x70] sm:$0xff]  }
 0x2e8   : > { %1365 = vpow2.f32 %v539_v4 }
 0x2ea   : > { %v724_v5 = vpop.permute.xlu1 %723 }
 0x2eb   : > { %v731_v6 = vsub.f32 %v698_v41, %v724_v5  ;;  %v1362_v5 = vld [vmem:[%s1781_s3 + $0x78] sm:$0xff]  }
 0x2ed   : > { %v733_v7 = vmul.f32 1.442695, %v731_v6 }
 0x2ee   : > { %v1364_v8 = vpop.eup %1363  ;;  %v729_v9 = vpop.permute.xlu1 %728 }
 0x2ef   : > { %1367 = vpow2.f32 %v733_v7  ;;  %v732_v10 = vsub.f32 %v701_v44, %v729_v9  ;;  %v545_v11 = vsel %vm510_vm3, %v1364_v8, 0.0 }
 0x2f0   : > { %546 = vadd.xlane.f32.xlu1 %v545_v11 }
 0x2f1   : > { %v735_v12 = vmul.f32 1.442695, %v732_v10 }
 0x2f2   : > { %v1366_v13 = vpop.eup %1365 }
 0x2f3   : > { %1369 = vpow2.f32 %v735_v12  ;;  %v548_v14 = vsel %vm510_vm3, %v1366_v13, 0.0  ;;  %v569_v16 = vpack.c.bf16 %v1366_v13, %v1364_v8 }
 0x2f4   : > { %549 = vadd.xlane.f32.xlu0 %v548_v14  ;;  %1371 = vpow2.f32 %v523_v19 }
 0x2f5   : > { %1207 = vmatmul.mubr.msk.bf16.vlgmr.msra.gmra.mrb[8].mxu0 %vm510_vm3, %v569_v16  ;;  %1373 = vpow2.f32 %v521_v23 }
 0x2f6   : > { %1217 = vmatpush3.bf16.msra.mxu0 %v366_v33  ;;  %1218 = vmatprep.mubr.msk.bf16.mxu0 %vm1469_vm1, %v1468_v15  ;;  %1375 = vpow2.f32 %v717_v24  ;;  %v1349_v33 = vld [vmem:[%s1781_s3 + $0x10] sm:$0xff]  }
 0x2f7   : > { %1222 = vmatprep.subr.bf16.mxu0 %v1468_v15  ;;  %1377 = vpow2.f32 %v719_v26  ;;  %1247 = vmatpush3.bf16.msra.mxu1 %v1349_v33 }
 0x2f8   : > { %1248 = vmatprep.subr.bf16.mxu1 %v1468_v15 }
 0x2f9   : > { %v1368_v17 = vpop.eup %1367 }
 0x2fa   : > { %v741_v18 = vsel %vm510_vm3, %v1368_v17, 0.0 }
 0x2fb   : > { %742 = vadd.xlane.f32.xlu1 %v741_v18  ;;  %1249 = vmatpush3.bf16.msra.mxu1 %v1350_v34 }
 0x2fc   : > { %1250 = vmatprep.subr.bf16.mxu1 %v1468_v15 }
 0x2fd   : > { %v1370_v20 = vpop.eup %1369 }
 0x2fe   : > { %v744_v21 = vsel %vm510_vm3, %v1370_v20, 0.0  ;;  %v765_v22 = vpack.c.bf16 %v1370_v20, %v1368_v17  ;;  %v1372_v25 = vpop.eup %1371 }
 0x2ff   : > { %745 = vadd.xlane.f32.xlu1 %v744_v21  ;;  %v1374_v27 = vpop.eup %1373  ;;  %1251 = vmatpush3.bf16.msra.mxu1 %v1351_v35  ;;  %v544_v42 = vmul.f32 %v1372_v25, %v542_v40 }
 0x300   : > { %1219 = vmatmul.mubr.msk.bf16.vlgmr.msra.gmra.mrb[12].mxu0 %vm510_vm3, %v765_v22  ;;  %v1376_v28 = vpop.eup %1375  ;;  %1252 = vmatprep.subr.bf16.mxu1 %v1468_v15  ;;  %v543_v38 = vmul.f32 %v1374_v27, %v541_v37 }
 0x301   : > { %1238 = vmatprep.mubr.msk.bf16.mxu0 %vm1469_vm1, %v1468_v15  ;;  %v1378_v29 = vpop.eup %1377  ;;  %1223 = vmatpush3.bf16.msra.mxu0 %v1352_v31 }
 0x302   : > { %1224 = vmatprep.subr.bf16.mxu0 %v1468_v15 }
 0x303   : > { %1253 = vmatpush3.bf16.msra.mxu1 %v1353_v36 }
 0x304   : > { %1254 = vmatprep.subr.bf16.mxu1 %v1468_v15 }
 0x305   : > { %1225 = vmatpush3.bf16.msra.mxu0 %v1354_v53 }
 0x306   : > { %1226 = vmatprep.subr.bf16.mxu0 %v1468_v15 }
 0x307   : > { %1255 = vmatpush3.bf16.msra.mxu1 %v1355_v54 }
 0x308   : > { %1256 = vmatprep.subr.bf16.mxu1 %v1468_v15 }
 0x309   : > { %1227 = vmatpush3.bf16.msra.mxu0 %v1356_v59 }
 0x30a   : > { %564 = vperm.xlu0 %1325, %v1372_v25   ;;  %1228 = vmatprep.subr.bf16.mxu0 %v1468_v15 }
 0x30b   : > { %1257 = vmatpush3.bf16.msra.mxu1 %v1357_v60 }
 0x30d   : > { %1229 = vmatpush3.bf16.msra.mxu0 %v1358_v62 }
 0x30e   : > { %1230 = vmatprep.subr.bf16.mxu0 %v1468_v15 }
 0x310   : > { %559 = vperm.xlu1 %1326, %v1374_v27  }
 0x311   : > { %1231 = vmatpush3.bf16.msra.mxu0 %v1359_v63 }
 0x312   : > { %1232 = vmatprep.subr.bf16.mxu0 %v1468_v15 }
 0x314   : > { %755 = vperm.xlu1 %1326, %v1376_v28  }
 0x315   : > { %1233 = vmatpush3.bf16.msra.mxu0 %v1360_v1 }
 0x316   : > { %1234 = vmatprep.subr.bf16.mxu0 %v1468_v15 }
 0x318   : > { %760 = vperm.xlu1 %1326, %v1378_v29  }
 0x319   : > { %1235 = vmatpush3.bf16.msra.mxu0 %v1361_v3 }
 0x31a   : > { %1236 = vmatprep.subr.bf16.mxu0 %v1468_v15 }
 0x31d   : > { %1237 = vmatpush3.bf16.msra.mxu0 %v1362_v5 }
 0x37d   : > { %v547_v39 = vpop.xlane.xlu1 %546 }
 0x37e   : > { %v551_v41 = vadd.f32 %v547_v39, %v543_v38 }
 0x380   : > { %553 = vst.msk [vmem:[#allocation5] sm:$0xff] %vm453_vm2, %v551_v41 }
 0x381   : > { %v550_v43 = vpop.xlane.xlu0 %549 }
 0x382   : > { %v552_v44 = vadd.f32 %v550_v43, %v544_v42 }
 0x384   : > { %554 = vst.msk [vmem:[#allocation5 + $0x8] sm:$0xff] %vm453_vm2, %v552_v44 }
 0x387   : > { %v622_v45 = vld [vmem:[#allocation5] sm:$0xff] }
 0x388   : > { %1379 = vrcp.f32 %v622_v45  ;;  %658 = vst.msk [vmem:[#allocation5] sm:$0xff] %vm453_vm2, %v1468_v15  ;;  %v743_v48 = vpop.xlane.xlu1 %742 }
 0x389   : > { %v565_v17 = vpop.permute.xlu0 %564 }
 0x38a   : > { %v568_v19 = vmul.f32 0.0, %v565_v17 }
 0x38b   : > { %v623_v46 = vld [vmem:[#allocation5 + $0x8] sm:$0xff] }
 0x38c   : > { %1381 = vrcp.f32 %v623_v46  ;;  %659 = vst.msk [vmem:[#allocation5 + $0x8] sm:$0xff] %vm453_vm2, %v1468_v15  ;;  %v746_v56 = vpop.xlane.xlu1 %745 }
 0x38f   : > { %v737_v47 = vld [vmem:[#allocation5] sm:$0xff] }
 0x390   : > { %v739_v49 = vmul.f32 %v1376_v28, %v737_v47  ;;  %v560_v14 = vpop.permute.xlu1 %559 }
 0x391   : > { %v567_v15 = vmul.f32 0.0, %v560_v14 }
 0x392   : > { %v1380_v50 = vpop.eup %1379  ;;  %v747_v51 = vadd.f32 %v743_v48, %v739_v49 }
 0x393   : > { %v738_v52 = vld [vmem:[#allocation5 + $0x8] sm:$0xff]  ;;  %628 = vperm.xlu1 %1326, %v1380_v50  }
 0x394   : > { %749 = vst.msk [vmem:[#allocation5] sm:$0xff] %vm453_vm2, %v747_v51  ;;  %v740_v55 = vmul.f32 %v1378_v29, %v738_v52  ;;  %v756_v16 = vpop.permute.xlu1 %755 }
 0x395   : > { %v763_v27 = vmul.f32 0.0, %v756_v16 }
 0x396   : > { %v1382_v57 = vpop.eup %1381  ;;  %v748_v58 = vadd.f32 %v746_v56, %v740_v55 }
 0x397   : > { %633 = vperm.xlu0 %1325, %v1382_v57  }
 0x398   : > { %750 = vst.msk [vmem:[#allocation5 + $0x8] sm:$0xff] %vm453_vm2, %v748_v58  ;;  %v761_v18 = vpop.permute.xlu1 %760 }
 0x399   : > { %v764_v28 = vmul.f32 0.0, %v761_v18 }
 0x39b   : > { %v818_v61 = vld [vmem:[#allocation5] sm:$0xff] }
 0x39c   : > { %1383 = vrcp.f32 %v818_v61 }
 0x39f   : > { %v819_v0 = vld [vmem:[#allocation5 + $0x8] sm:$0xff] }
 0x3a0   : > { %1385 = vrcp.f32 %v819_v0 }
 0x3a6   : > { %v1384_v2 = vpop.eup %1383 }
 0x3a7   : > { %824 = vperm.xlu1 %1326, %v1384_v2  }
 0x3aa   : > { %v1386_v4 = vpop.eup %1385 }
 0x3ab   : > { %829 = vperm.xlu0 %1325, %v1386_v4  }
 0x3c8   : > { %v607_v6 = vpop.f32.mrb[8].mxu0 }
 0x3c9   : > { %v1208_v7 = vpop.f32.mrb[9].mxu0  ;;  %v614_v21 = vadd.f32 %v607_v6, %v567_v15 }
 0x3ca   : > { %v610_v8 = vpop.f32.mrb[10].mxu0 }
 0x3cb   : > { %v1209_v9 = vpop.f32.mrb[11].mxu0  ;;  %v615_v22 = vadd.f32 %v610_v8, %v568_v19 }
 0x3d3   : > { %v803_v10 = vpop.f32.mrb[12].mxu0 }
 0x3d4   : > { %v1220_v11 = vpop.f32.mrb[13].mxu0  ;;  %v810_v30 = vadd.f32 %v803_v10, %v763_v27 }
 0x3d5   : > { %v806_v12 = vpop.f32.mrb[14].mxu0 }
 0x3d6   : > { %v1221_v13 = vpop.f32.mrb[15].mxu0  ;;  %v811_v31 = vadd.f32 %v806_v12, %v764_v28 }
 0x412   : > { %v629_v20 = vpop.permute.xlu1 %628 }
 0x413   : > { %v636_v24 = vmul.f32 %v629_v20, %v614_v21 }
 0x416   : > { %v634_v23 = vpop.permute.xlu0 %633 }
 0x417   : > { %v637_v25 = vmul.f32 %v634_v23, %v615_v22 }
 0x419   : > { %v638_v26 = vpack.c.bf16 %v637_v25, %v636_v24 }
 0x41b   : > { %1259 = vmatmul.mubr.bf16.vlgmr.msra.gmra.mrb[12].mxu1 %v638_v26 }
 0x426   : > { %v825_v29 = vpop.permute.xlu1 %824 }
 0x427   : > { %v832_v33 = vmul.f32 %v825_v29, %v810_v30 }
 0x42a   : > { %v830_v32 = vpop.permute.xlu0 %829 }
 0x42b   : > { %v833_v34 = vmul.f32 %v830_v32, %v811_v31 }
 0x42d   : > { %v834_v35 = vpack.c.bf16 %v833_v34, %v832_v33 }
 0x42f   : > { %1239 = vmatmul.mubr.bf16.vlgmr.msra.gmra.mrb[16].mxu0 %v834_v35 }
 0x4ee   : > { %v1022_v36 = vpop.f32.mrb[12].mxu1 }
 0x4ef   : > { %v1260_v37 = vpop.f32.mrb[13].mxu1 }
 0x4f0   : > { %v1025_v38 = vpop.f32.mrb[14].mxu1 }
 0x4f1   : > { %v1261_v39 = vpop.f32.mrb[15].mxu1 }
 0x502   : > { %v933_v40 = vpop.f32.mrb[16].mxu0 }
 0x503   : > { %v1023_v41 = vadd.f32 %v1022_v36, %v933_v40  ;;  %v1240_v42 = vpop.f32.mrb[17].mxu0 }
 0x504   : > { %v936_v43 = vpop.f32.mrb[18].mxu0 }
 0x505   : > { %1029 = vst.msk [vmem:[%s204_s26] sm:$0xff] %vm271_vm0, %v1023_v41  ;;  %v1026_v44 = vadd.f32 %v1025_v38, %v936_v43  ;;  %v1241_v45 = vpop.f32.mrb[19].mxu0 }
 0x507   : > { %1030 = vst.msk [vmem:[%s204_s26 + $0x8] sm:$0xff] %vm271_vm0, %v1026_v44 }
 0x508   : > { %1400 = shalt.err (!%p1397_p5)
}
 0x509   : > { %s1401_s12 = scalar_lea.hbm %s1729_s7, 256  ;;  %s1405_s21 = scalar_lea.hbm %s1782_s4, 512 }
 0x50a   : > { %p1402_p6 = scmp.ne.s32.totalorder %s1729_s7, %s1401_s12  ;;  %p1406_p10 = scmp.lt.u32.totalorder %s1729_s7, %s1782_s4 }
 0x50b   : > { %p1407_p11 = scmp.lt.u32.totalorder %s1405_s21, %s1401_s12  ;;  %p1409_p13 = scmp.lt.u32.totalorder %s1401_s12, %s1729_s7 }
 0x50c   : > { %p1403_p7 = pnand %p1402_p6, %p1539_p4 }
 0x50d   : > { %p1408_p12 = por %p1407_p11, %p1406_p10 }
 0x50e   : > { %p1404_p9 = pneg %p1403_p7 }
 0x50f   : > { %p1410_p0 = por %p1409_p13, %p1408_p12 }
 0x511   : > { %p1411_p1 = pnand %p1410_p0, %p1404_p9 }
 0x513   : > { %1414 = shalt.err (!%p1411_p1)
}
 0x514   : > { %s1472_s26 = smov 128   ;;  %s1473_s30 = smov 8  }
 0x515   : > { %1264 = dma.vmem_to_hbm [thread:$0]  (%p1539_p4), %s1723_s29, 256, %s1729_s7, %s1732_s18, %s1472_s26, %s1472_s26, %s1473_s30  }
 0x516 PF: > { %p1270_p2 = scmp.ge.s32.totalorder %s1465_s20, 2  ;;  %s1062_s5 = sand.u32 1, %s1445_s15  }
 0x517   : > { %s1063_s6 = scalar_lea.sflag [#allocation8], %s1062_s5 }
 0x518   : > { %p1267_p3 = pnand %p1270_p2, %p1546_p8 }
 0x51a   : > { %1440 = dma.done.wait (!%p1267_p3), %s1063_s6, 256  }
 0x51b   : > { %1442 = vsyncadd (!%p1267_p3), %s1063_s6, 4294967040  ;;  %s17_s20 = sadd.s32 1, %s1465_s20   ;;  %s1785_s15 = smov %s1449_s16 }
 0x51c   : > { %p14_p5 = scmp.ge.s32.totalorder %s17_s20, 4   ;;  %s1786_s16 = smov %s1453_s17 }
 0x51d   : > { %s1787_s17 = smov %s1552_s28  ;;  %s1788_s18 = smov %s1461_s19 }
 0x51e   : > { %s1789_s19 = smov %s1791_s23  ;;  %16 = sbr.rel (!%p14_p5) target bundleno = 4 (0x4), region = 78 }
 0x525   :  { %1068 = vsyncpa [#allocation8], 1 }
 0x526   :  { %1070 = vsyncpa [#allocation8 + $0x1], 1 }

</bundles_post_ra>
